<compile_context>
chip_gen: v7x
topology: tpu7x:2x2x1
jax: 0.10.0
libtpu: 0.0.40
codegen_flags: <defaults>
</compile_context>

<pallas_src>
import jax
import jax.numpy as jnp
from jax.experimental import pallas as pl
from jax.experimental.pallas import tpu as pltpu

EMBEDDING_DIM = 64
HIDDEN_DIM = 128
OUTPUT_DIM = 4
DEFAULT_BLOCK_B = 2048   # multiple of 256; sweepable
_MIN_SPLIT_B = 257       # below this, a single tile wins (per-step overhead dominates)


def decoder_kernel(x_ref, w1_ref, b1_ref, w2_ref, b2_ref, o_ref):
    # Cast x to the matmul-input dtype *inside* the kernel (no wrapper-side
    # astype pass over HBM; no-op on the pure-f32 path).
    x = x_ref[...].astype(w1_ref.dtype)
    # Layer 1: [tb, E] @ [E, H] on the MXU, f32 accumulation, +bias, ReLU (VPU).
    h = jnp.dot(x, w1_ref[...], preferred_element_type=jnp.float32)
    h = jnp.maximum(h + b1_ref[...], 0.0)
    # Layer 2: [tb, H] @ [H, O]; O == 4 == full array dim, stored directly
    # (no lane padding -> minimal writeback stream, still one contiguous DMA).
    out = jnp.dot(h.astype(w2_ref.dtype), w2_ref[...],
                  preferred_element_type=jnp.float32)
    o_ref[...] = (out + b2_ref[...]).astype(o_ref.dtype)


def decoder_forward(x, w1, b1, w2, b2, *, block_b=DEFAULT_BLOCK_B,
                    compute_dtype=None):
    """Decoder forward: linear2(relu(linear1(x))).

    x : [B, E] float32 (or already-narrow dtype from the caller)
    w1: [E, H], b1: [1, H]          (weights stored [in, out], bias as a row)
    w2: [H, O], b2: [1, O]
    compute_dtype: optional narrower matmul-input dtype (e.g. jnp.bfloat16).
      Accumulation, biases, ReLU and the output stay float32.
    """
    B, E = x.shape
    H = w1.shape[1]
    O = w2.shape[1]

    if compute_dtype is not None:
        # Weights are tiny (~33 KB); cast once per call. x is cast in-kernel.
        w1 = w1.astype(compute_dtype)
        w2 = w2.astype(compute_dtype)

    # --- batch tiling: no wrapper-side padding, Pallas masks the ragged last
    # block; guarantee >=2 grid steps for large B (v7x dual TensorCore). ------
    if B < _MIN_SPLIT_B:
        tb = B                                        # single tile (block == full dim)
    else:
        half = pl.cdiv(B, 2)
        tb = min(block_b, ((half + 255) // 256) * 256)  # multiple of 256, capped
    grid = (pl.cdiv(B, tb),)

    # --- advisory cost estimate (helps XLA schedule around the kernel) -------
    bytes_in = B * E * x.dtype.itemsize
    bytes_w = (w1.size * w1.dtype.itemsize + b1.size * b1.dtype.itemsize
               + w2.size * w2.dtype.itemsize + b2.size * b2.dtype.itemsize)
    bytes_out = B * O * 4
    cost = pl.CostEstimate(
        flops=2 * B * (E * H + H * O),
        transcendentals=0,
        bytes_accessed=bytes_in + bytes_w + bytes_out,
    )

    return pl.pallas_call(
        decoder_kernel,
        out_shape=jax.ShapeDtypeStruct((B, O), jnp.float32),
        grid=grid,
        in_specs=[
            pl.BlockSpec((tb, E), lambda i: (i, 0)),   # x: tiled over batch (auto double-buffered)
            pl.BlockSpec((E, H), lambda i: (0, 0)),    # weights/biases resident in VMEM
            pl.BlockSpec((1, H), lambda i: (0, 0)),
            pl.BlockSpec((H, O), lambda i: (0, 0)),
            pl.BlockSpec((1, O), lambda i: (0, 0)),
        ],
        out_specs=pl.BlockSpec((tb, O), lambda i: (i, 0)),
        compiler_params=pltpu.CompilerParams(
            dimension_semantics=("parallel",)),        # shards batch tiles across TCs on v7x
        cost_estimate=cost,
    )(x, w1, b1, w2, b2)


def xavier_normal(key, fan_in, fan_out):
    # torch.nn.init.xavier_normal_: std = sqrt(2 / (fan_in + fan_out)).
    # Stored [in, out]; xavier_normal is symmetric in distribution so the
    # transpose convention vs. PyTorch's [out, in] is immaterial.
    std = (2.0 / (fan_in + fan_out)) ** 0.5
    return std * jax.random.normal(key, (fan_in, fan_out), dtype=jnp.float32)


def reference_forward(x, w1, b1, w2, b2):
    h = jnp.maximum(x @ w1 + b1, 0.0)
    return h @ w2 + b2


if __name__ == "__main__":
    key = jax.random.PRNGKey(0)
    kx, kx2, k1, kb1, k2, kb2 = jax.random.split(key, 6)

    # Parameters (module-faithful: xavier_normal weights, zero biases).
    w1 = xavier_normal(k1, EMBEDDING_DIM, HIDDEN_DIM)
    w2 = xavier_normal(k2, HIDDEN_DIM, OUTPUT_DIM)
    b1_zero = jnp.zeros((1, HIDDEN_DIM), dtype=jnp.float32)
    b2_zero = jnp.zeros((1, OUTPUT_DIM), dtype=jnp.float32)
    # Nonzero biases to exercise the bias-broadcast path.
    b1_nz = 0.1 * jax.random.normal(kb1, (1, HIDDEN_DIM), dtype=jnp.float32)
    b2_nz = 0.1 * jax.random.normal(kb2, (1, OUTPUT_DIM), dtype=jnp.float32)

    # 1) Small batch, module-faithful init, f32 path, single tile.
    B_small = 8
    x_small = jax.random.normal(kx, (B_small, EMBEDDING_DIM), dtype=jnp.float32)
    out = jax.block_until_ready(decoder_forward(x_small, w1, b1_zero, w2, b2_zero))
    ref = reference_forward(x_small, w1, b1_zero, w2, b2_zero)
    assert out.shape == (B_small, OUTPUT_DIM)
    assert jnp.allclose(out, ref, atol=1e-5, rtol=1e-5)

    # 2) Small batch, nonzero biases, f32 path.
    out = jax.block_until_ready(decoder_forward(x_small, w1, b1_nz, w2, b2_nz))
    ref = reference_forward(x_small, w1, b1_nz, w2, b2_nz)
    assert jnp.allclose(out, ref, atol=1e-5, rtol=1e-5)

    # 3) Multi-tile, non-multiple-of-tile batch: exercises the >=2-step grid
    #    and the masked ragged boundary block (no wrapper-side padding).
    B_big = 1000
    x_big = jax.random.normal(kx2, (B_big, EMBEDDING_DIM), dtype=jnp.float32)
    out = jax.block_until_ready(decoder_forward(x_big, w1, b1_nz, w2, b2_nz))
    ref = reference_forward(x_big, w1, b1_nz, w2, b2_nz)
    assert out.shape == (B_big, OUTPUT_DIM)
    assert jnp.allclose(out, ref, atol=1e-5, rtol=1e-5)

    # 4) bf16 matmul-input path (f32 accumulation), looser tolerance.
    out_bf16 = jax.block_until_ready(
        decoder_forward(x_big, w1, b1_nz, w2, b2_nz, compute_dtype=jnp.bfloat16))
    assert jnp.allclose(out_bf16, ref, atol=5e-2, rtol=5e-2)

    print("KERNEL_OK")
</pallas_src>

<mosaic_0001>
module attributes {stable_mosaic.version = 11 : i64} {
  func.func @decoder_kernel(%arg0: i32, %arg1: memref<8x64xf32, #tpu.memory_space<vmem>>, %arg2: memref<64x128xf32, #tpu.memory_space<vmem>>, %arg3: memref<1x128xf32, #tpu.memory_space<vmem>>, %arg4: memref<128x4xf32, #tpu.memory_space<vmem>>, %arg5: memref<1x4xf32, #tpu.memory_space<vmem>>, %arg6: memref<8x4xf32, #tpu.memory_space<vmem>>) attributes {dimension_semantics = [#tpu.dimension_semantics<parallel>], iteration_bounds = array<i64: 1>, scalar_prefetch = 0 : i64, scratch_operands = 0 : i64, tpu.core_type = #tpu.core_type<tc>, window_params = [{transform_indices = @transform_0, window_bounds = array<i64: 8, 64>}, {pipeline_mode = #tpu.pipeline_mode<synchronous>, transform_indices = @transform_1, window_bounds = array<i64: 64, 128>}, {pipeline_mode = #tpu.pipeline_mode<synchronous>, transform_indices = @transform_2, window_bounds = array<i64: 1, 128>}, {pipeline_mode = #tpu.pipeline_mode<synchronous>, transform_indices = @transform_3, window_bounds = array<i64: 128, 4>}, {pipeline_mode = #tpu.pipeline_mode<synchronous>, transform_indices = @transform_4, window_bounds = array<i64: 1, 4>}, {transform_indices = @transform_5, window_bounds = array<i64: 8, 4>}]} {
    %c0 = arith.constant 0 : index
    %c0_0 = arith.constant 0 : index
    %0 = vector.load %arg1[%c0, %c0_0] : memref<8x64xf32, #tpu.memory_space<vmem>>, vector<8x64xf32>
    %c0_1 = arith.constant 0 : index
    %c0_2 = arith.constant 0 : index
    %1 = vector.load %arg2[%c0_1, %c0_2] : memref<64x128xf32, #tpu.memory_space<vmem>>, vector<64x128xf32>
    %cst = arith.constant dense<0.000000e+00> : vector<8x128xf32>
    %2 = tpu.matmul %0, %1, %cst {dimension_numbers = #tpu.dot_dimension_numbers<[1], [0], [0], [1], [0, 0, 1, 1], [], []>} : vector<8x64xf32>, vector<64x128xf32>, vector<8x128xf32> -> vector<8x128xf32>
    %c0_3 = arith.constant 0 : index
    %c0_4 = arith.constant 0 : index
    %3 = vector.load %arg3[%c0_3, %c0_4] : memref<1x128xf32, #tpu.memory_space<vmem>>, vector<1x128xf32>
    %4 = vector.broadcast %3 : vector<1x128xf32> to vector<8x128xf32>
    %5 = arith.addf %2, %4 : vector<8x128xf32>
    %cst_5 = arith.constant 0.000000e+00 : f32
    %6 = vector.broadcast %cst_5 : f32 to vector<8x128xf32>
    %7 = arith.maximumf %5, %6 : vector<8x128xf32>
    %c0_6 = arith.constant 0 : index
    %c0_7 = arith.constant 0 : index
    %8 = vector.load %arg4[%c0_6, %c0_7] : memref<128x4xf32, #tpu.memory_space<vmem>>, vector<128x4xf32>
    %cst_8 = arith.constant dense<0.000000e+00> : vector<8x4xf32>
    %9 = tpu.matmul %7, %8, %cst_8 {dimension_numbers = #tpu.dot_dimension_numbers<[1], [0], [0], [1], [0, 0, 1, 1], [], []>} : vector<8x128xf32>, vector<128x4xf32>, vector<8x4xf32> -> vector<8x4xf32>
    %c0_9 = arith.constant 0 : index
    %c0_10 = arith.constant 0 : index
    %10 = vector.load %arg5[%c0_9, %c0_10] : memref<1x4xf32, #tpu.memory_space<vmem>>, vector<1x4xf32>
    %11 = vector.broadcast %10 : vector<1x4xf32> to vector<8x4xf32>
    %12 = arith.addf %9, %11 : vector<8x4xf32>
    %c0_11 = arith.constant 0 : index
    %c0_12 = arith.constant 0 : index
    %13 = vector.load %arg6[%c0_11, %c0_12] : memref<8x4xf32, #tpu.memory_space<vmem>>, vector<8x4xf32>
    tpu.vector_store %arg6[%c0_11, %c0_12], %12 {strides = array<i32>} : memref<8x4xf32, #tpu.memory_space<vmem>>, vector<8x4xf32>,
    return
  }
  func.func @transform_0(%arg0: i32) -> (i32, i32) {
    %c0_i32 = arith.constant 0 : i32
    %c0_i32_0 = arith.constant 0 : i32
    return %arg0, %c0_i32 : i32, i32
  }
  func.func @transform_1(%arg0: i32) -> (i32, i32) {
    %c0_i32 = arith.constant 0 : i32
    %c0_i32_0 = arith.constant 0 : i32
    %c0_i32_1 = arith.constant 0 : i32
    return %c0_i32, %c0_i32_0 : i32, i32
  }
  func.func @transform_2(%arg0: i32) -> (i32, i32) {
    %c0_i32 = arith.constant 0 : i32
    %c0_i32_0 = arith.constant 0 : i32
    %c0_i32_1 = arith.constant 0 : i32
    return %c0_i32, %c0_i32_0 : i32, i32
  }
  func.func @transform_3(%arg0: i32) -> (i32, i32) {
    %c0_i32 = arith.constant 0 : i32
    %c0_i32_0 = arith.constant 0 : i32
    %c0_i32_1 = arith.constant 0 : i32
    return %c0_i32, %c0_i32_0 : i32, i32
  }
  func.func @transform_4(%arg0: i32) -> (i32, i32) {
    %c0_i32 = arith.constant 0 : i32
    %c0_i32_0 = arith.constant 0 : i32
    %c0_i32_1 = arith.constant 0 : i32
    return %c0_i32, %c0_i32_0 : i32, i32
  }
  func.func @transform_5(%arg0: i32) -> (i32, i32) {
    %c0_i32 = arith.constant 0 : i32
    %c0_i32_0 = arith.constant 0 : i32
    return %arg0, %c0_i32 : i32, i32
  }
}

</mosaic_0001>

<bundles_post_ra>
// kernel: tpu_custom_call.1
= control target key start
LH: loop header
LB: loop body
LE: loop exit
PB: predicated region body
PF: predicated region fallthrough
CT: control target
= control target key end

     0   :  { %v332_v0 = vmov 0.0|0.0   ;;  %vm333_vm0 = vmmov 0   ;;  %v334_v4 = vmov 0.0   ;;  %vm36_vm1 = vcmask 523264   ;;  %s461_s1 = inlined_call_operand.vmem [shape: f32[64,128], index: 1, kind: input, shape index: {}]   ;;  %s462_s3 = inlined_call_operand.vmem [shape: f32[128,4], index: 3, kind: input, shape index: {}]   ;;  %s463_s0 = inlined_call_operand.vmem [shape: f32[8,64], index: 0, kind: input, shape index: {}]   ;;  %s464_s2 = inlined_call_operand.vmem [shape: f32[1,128], index: 2, kind: input, shape index: {}]   ;;  %s465_s4 = inlined_call_operand.vmem [shape: f32[1,4], index: 4, kind: input, shape index: {}]   ;;  %s466_s5 = inlined_call_operand.vmem [shape: f32[8,4], index: 5, kind: output, shape index: {}]  }
   0x1   :  { %293 = vmatprep.subr.bf16.mxu0 %v332_v0  ;;  %v21_v1 = vld [vmem:[%s461_s1] sm:$0xff]  ;;  %v22_v2 = vld [vmem:[%s461_s1 + $0x8] sm:$0xff]  ;;  %v23_v3 = vld [vmem:[%s461_s1 + $0x10] sm:$0xff]  ;;  %255 = vmatprep.mubr.msk.f32.mxu0 %vm333_vm0, %v334_v4  ;;  %vm204_vm2 = vcmask 31744  }
   0x2   :  { %v294_v5 = vpack.c.bf16 %v22_v2, %v21_v1  ;;  %v24_v6 = vld [vmem:[%s461_s1 + $0x18] sm:$0xff]  ;;  %305 = vmatprep.subr.bf16.mxu1 %v332_v0  ;;  %290 = vmatprep.mubr.msk.f32.mxu1 %vm333_vm0, %v334_v4  ;;  %v111_v8 = vld [vmem:[%s462_s3] sm:$0xff]  ;;  %v112_v9 = vld [vmem:[%s462_s3 + $0x8] sm:$0xff] }
   0x3   :  { %v297_v7 = vpack.c.bf16 %v24_v6, %v23_v3  ;;  %v113_v10 = vld [vmem:[%s462_s3 + $0x10] sm:$0xff]  ;;  %v25_v11 = vld [vmem:[%s461_s1 + $0x20] sm:$0xff]  ;;  %v26_v12 = vld [vmem:[%s461_s1 + $0x28] sm:$0xff]  ;;  %v306_v13 = vpack.c.bf16 %v112_v9, %v111_v8 }
   0x4   :  { %295 = vmatpush3.bf16.msra.mxu0 %v294_v5  ;;  %v114_v14 = vld [vmem:[%s462_s3 + $0x18] sm:$0xff]  ;;  %v300_v16 = vpack.c.bf16 %v26_v12, %v25_v11  ;;  %v115_v17 = vld [vmem:[%s462_s3 + $0x20] sm:$0xff]  ;;  %v116_v18 = vld [vmem:[%s462_s3 + $0x28] sm:$0xff] }
   0x5   :  { %296 = vmatprep.subr.bf16.mxu0 %v332_v0  ;;  %307 = vmatpush3.bf16.msra.mxu1 %v306_v13  ;;  %v309_v15 = vpack.c.bf16 %v114_v14, %v113_v10  ;;  %v27_v19 = vld [vmem:[%s461_s1 + $0x30] sm:$0xff]  ;;  %v28_v20 = vld [vmem:[%s461_s1 + $0x38] sm:$0xff]  ;;  %v312_v21 = vpack.c.bf16 %v116_v18, %v115_v17  ;;  %v20_v26 = vld [vmem:[%s463_s0] sm:$0xff] }
   0x6   :  { %308 = vmatprep.subr.bf16.mxu1 %v332_v0  ;;  %v303_v22 = vpack.c.bf16 %v28_v20, %v27_v19  ;;  %v117_v23 = vld [vmem:[%s462_s3 + $0x30] sm:$0xff]  ;;  %v118_v24 = vld [vmem:[%s462_s3 + $0x38] sm:$0xff]  ;;  %v119_v27 = vld [vmem:[%s462_s3 + $0x40] sm:$0xff] }
   0x7   :  { %v315_v25 = vpack.c.bf16 %v118_v24, %v117_v23  ;;  %v120_v28 = vld [vmem:[%s462_s3 + $0x48] sm:$0xff]  ;;  %v121_v30 = vld [vmem:[%s462_s3 + $0x50] sm:$0xff]  ;;  %v122_v31 = vld [vmem:[%s462_s3 + $0x58] sm:$0xff] }
   0x8   :  { %298 = vmatpush3.bf16.msra.mxu0 %v297_v7  ;;  %v318_v29 = vpack.c.bf16 %v120_v28, %v119_v27  ;;  %v321_v32 = vpack.c.bf16 %v122_v31, %v121_v30  ;;  %v123_v33 = vld [vmem:[%s462_s3 + $0x60] sm:$0xff]  ;;  %v124_v34 = vld [vmem:[%s462_s3 + $0x68] sm:$0xff]  ;;  %v125_v36 = vld [vmem:[%s462_s3 + $0x70] sm:$0xff] }
   0x9   :  { %299 = vmatprep.subr.bf16.mxu0 %v332_v0  ;;  %310 = vmatpush3.bf16.msra.mxu1 %v309_v15  ;;  %v324_v35 = vpack.c.bf16 %v124_v34, %v123_v33  ;;  %v126_v37 = vld [vmem:[%s462_s3 + $0x78] sm:$0xff]  ;;  %v210_v39 = vld [vmem:[%s464_s2] ss:$0 sm:$0xff] }
   0xa   :  { %311 = vmatprep.subr.bf16.mxu1 %v332_v0  ;;  %v327_v38 = vpack.c.bf16 %v126_v37, %v125_v36  ;;  %v212_v44 = vld [vmem:[%s465_s4] ss:$0 sm:$0xff] }
   0xc   :  { %301 = vmatpush3.bf16.msra.mxu0 %v300_v16 }
   0xd   :  { %302 = vmatprep.subr.bf16.mxu0 %v332_v0  ;;  %313 = vmatpush3.bf16.msra.mxu1 %v312_v21 }
   0xe   :  { %314 = vmatprep.subr.bf16.mxu1 %v332_v0 }
  0x10   :  { %304 = vmatpush3.bf16.msra.mxu0 %v303_v22 }
  0x11   :  { %316 = vmatpush3.bf16.msra.mxu1 %v315_v25 }
  0x12   :  { %317 = vmatprep.subr.bf16.mxu1 %v332_v0 }
  0x13   :  { %256 = vmatmul.mubr.msk.f32.vlgmr.msra.gmra.mrb[0].mxu0 %vm36_vm1, %v20_v26 }
  0x15   :  { %319 = vmatpush3.bf16.msra.mxu1 %v318_v29 }
  0x16   :  { %320 = vmatprep.subr.bf16.mxu1 %v332_v0 }
  0x19   :  { %322 = vmatpush3.bf16.msra.mxu1 %v321_v32 }
  0x1a   :  { %323 = vmatprep.subr.bf16.mxu1 %v332_v0 }
  0x1d   :  { %325 = vmatpush3.bf16.msra.mxu1 %v324_v35 }
  0x1e   :  { %326 = vmatprep.subr.bf16.mxu1 %v332_v0 }
  0x21   :  { %328 = vmatpush3.bf16.msra.mxu1 %v327_v38 }
  0xe6   :  { %v106_v40 = vpop.f32.mrb[0].mxu0 }
  0xe7   :  { %v107_v41 = vadd.f32 %v210_v39, %v106_v40  ;;  %v257_v42 = vpop.f32.mrb[1].mxu0 }
  0xe9   :  { %v110_v43 = vmax.f32 %v107_v41, 0.0 }
  0xeb   :  { %291 = vmatmul.mubr.f32.vlgmr.msra.gmra.mrb[0].mxu1 %v110_v43 }
 0x1be   :  { %v200_v45 = vpop.f32.mrb[0].mxu1 }
 0x1bf   :  { %v201_v46 = vadd.f32 %v212_v44, %v200_v45  ;;  %v292_v47 = vpop.f32.mrb[1].mxu1 }
 0x1c1   :  { %205 = vst.msk [vmem:[%s466_s5] sm:$0xff] %vm204_vm2, %v201_v46 }

</bundles_post_ra>
